<compile_context>
chip_gen: v5e
topology: v5e:2x2
jax: 0.10.0
libtpu: 0.0.40
codegen_flags: <defaults>
</compile_context>

<pallas_src>
import functools

import jax
import jax.numpy as jnp
from jax.experimental import pallas as pl
from jax.experimental.pallas import tpu as pltpu


# ----------------------------------------------------------------------------- helpers
def _ceil_to(n, m):
    return ((n + m - 1) // m) * m


def _pad2(a, rows, cols):
    r, c = a.shape
    return jnp.pad(a, ((0, rows - r), (0, cols - c)))


# ----------------------------------------------------------------------------- fused kernel
def _pooler_kernel(x_ref, w1_ref, b1_ref, w2_ref, b2_ref, o_ref, acc_ref):
    k = pl.program_id(1)

    @pl.when(k == 0)
    def _():
        acc_ref[...] = jnp.zeros_like(acc_ref)

    # fc1 partial product for this K tile (bf16 operands, f32 accumulation on MXU).
    acc_ref[...] += jnp.dot(
        x_ref[...], w1_ref[...], preferred_element_type=jnp.float32
    )

    @pl.when(k == pl.num_programs(1) - 1)
    def _():
        # Epilogue fused into the last K step: bias + ReLU + fc3 + bias + sigmoid.
        h = jnp.maximum(acc_ref[...] + b1_ref[...], 0.0)
        out = (
            jnp.dot(
                h.astype(jnp.bfloat16),
                w2_ref[...],
                preferred_element_type=jnp.float32,
            )
            + b2_ref[...]
        )
        o_ref[...] = jax.nn.sigmoid(out)


def nn_pooler_forward(params, x):
    """x: (M, F) float32 -> (M, 1) float32 (sigmoid scores)."""
    M, F = x.shape
    H = params["w1"].shape[1]   # 5
    N = params["w2"].shape[1]   # 1

    # Lane-dense padded sizes.
    Hp = _ceil_to(H, 128)
    Np = _ceil_to(N, 128)

    # K tiling (fc1 contraction dim).
    tk = 512
    Fp = _ceil_to(F, 128)
    if Fp <= tk:
        tk = Fp
    else:
        Fp = _ceil_to(Fp, tk)

    # M tiling (batch rows); sublane multiple of 16 for bf16 operands.
    tm = min(128, _ceil_to(M, 16))
    Mp = _ceil_to(M, tm)

    # Pad + cast MXU operands to bf16; keep biases f32.
    xp = _pad2(x.astype(jnp.float32), Mp, Fp).astype(jnp.bfloat16)
    w1p = _pad2(params["w1"], Fp, Hp).astype(jnp.bfloat16)
    b1p = _pad2(params["b1"].reshape(1, H), 1, Hp).astype(jnp.float32)
    w2p = _pad2(params["w2"], Hp, Np).astype(jnp.bfloat16)
    b2p = _pad2(params["b2"].reshape(1, N), 1, Np).astype(jnp.float32)

    # Generation-aware VMEM budget: what the tiles need (double-buffered) + margin,
    # capped far below v7x's 64 MiB physical VMEM.
    tile_bytes = (
        tm * tk * 2      # x tile (bf16)
        + tk * Hp * 2    # w1 tile (bf16)
        + Hp * 4         # b1
        + Hp * Np * 2    # w2 (bf16)
        + Np * 4         # b2
        + tm * Np * 4    # out tile
    )
    vmem_limit = min(max(4 * tile_bytes + tm * Hp * 4 + (4 << 20), 4 << 20), 32 << 20)

    grid = (Mp // tm, Fp // tk)

    out = pl.pallas_call(
        _pooler_kernel,
        out_shape=jax.ShapeDtypeStruct((Mp, Np), jnp.float32),
        grid_spec=pltpu.PrefetchScalarGridSpec(
            num_scalar_prefetch=0,
            grid=grid,
            in_specs=[
                pl.BlockSpec((tm, tk), lambda i, k: (i, k)),   # x
                pl.BlockSpec((tk, Hp), lambda i, k: (k, 0)),   # w1
                pl.BlockSpec((1, Hp), lambda i, k: (0, 0)),    # b1
                pl.BlockSpec((Hp, Np), lambda i, k: (0, 0)),   # w2
                pl.BlockSpec((1, Np), lambda i, k: (0, 0)),    # b2
            ],
            out_specs=pl.BlockSpec((tm, Np), lambda i, k: (i, 0)),
            scratch_shapes=[pltpu.VMEM((tm, Hp), jnp.float32)],
        ),
        compiler_params=pltpu.CompilerParams(
            dimension_semantics=("parallel", "arbitrary"),
            vmem_limit_bytes=vmem_limit,
        ),
    )(xp, w1p, b1p, w2p, b2p)

    return out[:M, :N]


# ----------------------------------------------------------------------------- params (PyTorch Linear-style init)
def _linear_init(key, fan_in, fan_out):
    kw, kb = jax.random.split(key)
    bound = 1.0 / (fan_in ** 0.5)
    w = jax.random.uniform(kw, (fan_in, fan_out), jnp.float32, -bound, bound)
    b = jax.random.uniform(kb, (fan_out,), jnp.float32, -bound, bound)
    return w, b


def init_params(key, input_features):
    k1, k2 = jax.random.split(key)
    w1, b1 = _linear_init(k1, input_features, 5)
    w2, b2 = _linear_init(k2, 5, 1)
    return {"w1": w1, "b1": b1, "w2": w2, "b2": b2}


# ----------------------------------------------------------------------------- reference (pure JAX) for verification
def nn_pooler_ref(params, x):
    h = jnp.maximum(x @ params["w1"] + params["b1"], 0.0)
    return jax.nn.sigmoid(h @ params["w2"] + params["b2"])


# ----------------------------------------------------------------------------- main
if __name__ == "__main__":
    key = jax.random.PRNGKey(0)
    pkey, xkey = jax.random.split(key)

    input_features = 32
    batch = 8

    params = init_params(pkey, input_features)
    x = jax.random.normal(xkey, (batch, input_features), jnp.float32)

    out = nn_pooler_forward(params, x)
    out = jax.block_until_ready(out)

    ref = nn_pooler_ref(params, x)

    assert out.shape == (batch, 1)
    assert bool(jnp.all((out >= 0.0) & (out <= 1.0)))
    # bf16 MXU operands with f32 accumulation -> ~1e-2 tolerance after sigmoid.
    assert bool(jnp.max(jnp.abs(out - ref)) < 2e-2)
    print("KERNEL_OK")
</pallas_src>

<mosaic_0001>
module attributes {stable_mosaic.version = 11 : i64} {
  func.func @_pooler_kernel(%arg0: i32, %arg1: i32, %arg2: memref<16x128xbf16, #tpu.memory_space<vmem>>, %arg3: memref<128x128xbf16, #tpu.memory_space<vmem>>, %arg4: memref<1x128xf32, #tpu.memory_space<vmem>>, %arg5: memref<128x128xbf16, #tpu.memory_space<vmem>>, %arg6: memref<1x128xf32, #tpu.memory_space<vmem>>, %arg7: memref<16x128xf32, #tpu.memory_space<vmem>>, %arg8: memref<16x128xf32, #tpu.memory_space<vmem>>) attributes {dimension_semantics = [#tpu.dimension_semantics<parallel>, #tpu.dimension_semantics<arbitrary>], iteration_bounds = array<i64: 1, 1>, scalar_prefetch = 0 : i64, scratch_operands = 1 : i64, tpu.core_type = #tpu.core_type<tc>, window_params = [{transform_indices = @transform_0, window_bounds = array<i64: 16, 128>}, {transform_indices = @transform_1, window_bounds = array<i64: 128, 128>}, {pipeline_mode = #tpu.pipeline_mode<synchronous>, transform_indices = @transform_2, window_bounds = array<i64: 1, 128>}, {pipeline_mode = #tpu.pipeline_mode<synchronous>, transform_indices = @transform_3, window_bounds = array<i64: 128, 128>}, {pipeline_mode = #tpu.pipeline_mode<synchronous>, transform_indices = @transform_4, window_bounds = array<i64: 1, 128>}, {transform_indices = @transform_5, window_bounds = array<i64: 16, 128>}]} {
    %c0_i32 = arith.constant 0 : i32
    %0 = arith.cmpi eq, %arg1, %c0_i32 : i32
    %1 = arith.extui %0 : i1 to i32
    %c0_i32_0 = arith.constant 0 : i32
    %2 = arith.cmpi ne, %1, %c0_i32_0 : i32
    scf.if %2 {
      %cst_10 = arith.constant 0.000000e+00 : f32
      %12 = vector.broadcast %cst_10 : f32 to vector<16x128xf32>
      %c0_11 = arith.constant 0 : index
      %c0_12 = arith.constant 0 : index
      %13 = vector.load %arg8[%c0_11, %c0_12] : memref<16x128xf32, #tpu.memory_space<vmem>>, vector<16x128xf32>
      tpu.vector_store %arg8[%c0_11, %c0_12], %12 {strides = array<i32>} : memref<16x128xf32, #tpu.memory_space<vmem>>, vector<16x128xf32>,
    } else {
    }
    %c0 = arith.constant 0 : index
    %c0_1 = arith.constant 0 : index
    %3 = vector.load %arg8[%c0, %c0_1] : memref<16x128xf32, #tpu.memory_space<vmem>>, vector<16x128xf32>
    %c0_2 = arith.constant 0 : index
    %c0_3 = arith.constant 0 : index
    %4 = vector.load %arg2[%c0_2, %c0_3] : memref<16x128xbf16, #tpu.memory_space<vmem>>, vector<16x128xbf16>
    %c0_4 = arith.constant 0 : index
    %c0_5 = arith.constant 0 : index
    %5 = vector.load %arg3[%c0_4, %c0_5] : memref<128x128xbf16, #tpu.memory_space<vmem>>, vector<128x128xbf16>
    %cst = arith.constant dense<0.000000e+00> : vector<16x128xf32>
    %6 = tpu.matmul %4, %5, %cst {dimension_numbers = #tpu.dot_dimension_numbers<[1], [0], [0], [1], [0, 0, 1, 1], [], []>} : vector<16x128xbf16>, vector<128x128xbf16>, vector<16x128xf32> -> vector<16x128xf32>
    %7 = arith.addf %3, %6 : vector<16x128xf32>
    %c0_6 = arith.constant 0 : index
    %c0_7 = arith.constant 0 : index
    %8 = vector.load %arg8[%c0_6, %c0_7] : memref<16x128xf32, #tpu.memory_space<vmem>>, vector<16x128xf32>
    tpu.vector_store %arg8[%c0_6, %c0_7], %7 {strides = array<i32>} : memref<16x128xf32, #tpu.memory_space<vmem>>, vector<16x128xf32>,
    %c0_i32_8 = arith.constant 0 : i32
    %9 = arith.cmpi eq, %arg1, %c0_i32_8 : i32
    %10 = arith.extui %9 : i1 to i32
    %c0_i32_9 = arith.constant 0 : i32
    %11 = arith.cmpi ne, %10, %c0_i32_9 : i32
    scf.if %11 {
      %c0_10 = arith.constant 0 : index
      %c0_11 = arith.constant 0 : index
      %12 = vector.load %arg8[%c0_10, %c0_11] : memref<16x128xf32, #tpu.memory_space<vmem>>, vector<16x128xf32>
      %c0_12 = arith.constant 0 : index
      %c0_13 = arith.constant 0 : index
      %13 = vector.load %arg4[%c0_12, %c0_13] : memref<1x128xf32, #tpu.memory_space<vmem>>, vector<1x128xf32>
      %14 = vector.broadcast %13 : vector<1x128xf32> to vector<16x128xf32>
      %15 = arith.addf %12, %14 : vector<16x128xf32>
      %cst_14 = arith.constant 0.000000e+00 : f32
      %16 = vector.broadcast %cst_14 : f32 to vector<16x128xf32>
      %17 = arith.maximumf %15, %16 : vector<16x128xf32>
      %18 = arith.truncf %17 : vector<16x128xf32> to vector<16x128xbf16>
      %c0_15 = arith.constant 0 : index
      %c0_16 = arith.constant 0 : index
      %19 = vector.load %arg5[%c0_15, %c0_16] : memref<128x128xbf16, #tpu.memory_space<vmem>>, vector<128x128xbf16>
      %cst_17 = arith.constant dense<0.000000e+00> : vector<16x128xf32>
      %20 = tpu.matmul %18, %19, %cst_17 {dimension_numbers = #tpu.dot_dimension_numbers<[1], [0], [0], [1], [0, 0, 1, 1], [], []>} : vector<16x128xbf16>, vector<128x128xbf16>, vector<16x128xf32> -> vector<16x128xf32>
      %c0_18 = arith.constant 0 : index
      %c0_19 = arith.constant 0 : index
      %21 = vector.load %arg6[%c0_18, %c0_19] : memref<1x128xf32, #tpu.memory_space<vmem>>, vector<1x128xf32>
      %22 = vector.broadcast %21 : vector<1x128xf32> to vector<16x128xf32>
      %23 = arith.addf %20, %22 : vector<16x128xf32>
      %24 = arith.negf %23 : vector<16x128xf32>
      %25 = math.exp %24 : vector<16x128xf32>
      %cst_20 = arith.constant 1.000000e+00 : f32
      %26 = vector.broadcast %cst_20 : f32 to vector<16x128xf32>
      %27 = arith.addf %26, %25 : vector<16x128xf32>
      %28 = arith.divf %26, %27 : vector<16x128xf32>
      %c0_21 = arith.constant 0 : index
      %c0_22 = arith.constant 0 : index
      %29 = vector.load %arg7[%c0_21, %c0_22] : memref<16x128xf32, #tpu.memory_space<vmem>>, vector<16x128xf32>
      tpu.vector_store %arg7[%c0_21, %c0_22], %28 {strides = array<i32>} : memref<16x128xf32, #tpu.memory_space<vmem>>, vector<16x128xf32>,
    } else {
    }
    return
  }
  func.func @transform_0(%arg0: i32, %arg1: i32) -> (i32, i32) {
    %c0_i32 = arith.constant 0 : i32
    return %arg0, %arg1 : i32, i32
  }
  func.func @transform_1(%arg0: i32, %arg1: i32) -> (i32, i32) {
    %c0_i32 = arith.constant 0 : i32
    %c0_i32_0 = arith.constant 0 : i32
    return %arg1, %c0_i32 : i32, i32
  }
  func.func @transform_2(%arg0: i32, %arg1: i32) -> (i32, i32) {
    %c0_i32 = arith.constant 0 : i32
    %c0_i32_0 = arith.constant 0 : i32
    %c0_i32_1 = arith.constant 0 : i32
    return %c0_i32, %c0_i32_0 : i32, i32
  }
  func.func @transform_3(%arg0: i32, %arg1: i32) -> (i32, i32) {
    %c0_i32 = arith.constant 0 : i32
    %c0_i32_0 = arith.constant 0 : i32
    %c0_i32_1 = arith.constant 0 : i32
    return %c0_i32, %c0_i32_0 : i32, i32
  }
  func.func @transform_4(%arg0: i32, %arg1: i32) -> (i32, i32) {
    %c0_i32 = arith.constant 0 : i32
    %c0_i32_0 = arith.constant 0 : i32
    %c0_i32_1 = arith.constant 0 : i32
    return %c0_i32, %c0_i32_0 : i32, i32
  }
  func.func @transform_5(%arg0: i32, %arg1: i32) -> (i32, i32) {
    %c0_i32 = arith.constant 0 : i32
    %c0_i32_0 = arith.constant 0 : i32
    return %arg0, %c0_i32 : i32, i32
  }
}

</mosaic_0001>

<bundles_post_ra>
// kernel: tpu_custom_call.1
= control target key start
LH: loop header
LB: loop body
LE: loop exit
PB: predicated region body
PF: predicated region fallthrough
CT: control target
= control target key end

     0   :  { %10 = vsyncpa [#allocation4], 0  ;;  %s585_s0 = inlined_call_operand.hbm [shape: bf16[16,128], index: 0, kind: input, shape index: {}]   ;;  %s586_s1 = inlined_call_operand.hbm [shape: bf16[128,128], index: 1, kind: input, shape index: {}]   ;;  %s587_s2 = inlined_call_operand.vmem [shape: f32[1,128], index: 2, kind: input, shape index: {}]   ;;  %s588_s3 = inlined_call_operand.hbm [shape: bf16[128,128], index: 3, kind: input, shape index: {}]   ;;  %s589_s4 = inlined_call_operand.vmem [shape: f32[1,128], index: 4, kind: input, shape index: {}]   ;;  %s590_s5 = inlined_call_operand.hbm [shape: f32[16,128], index: 5, kind: output, shape index: {}]  }
   0x1   :  { %11 = vsyncpa [#allocation7], 0 }
   0x2   :  { %12 = vsyncpa [#allocation5], 0  ;;  %s30_s20 = sshll.u32 %s586_s1, 4  ;;  %s529_s21 = smov [#allocation6]   ;;  %s31_s20 = int_to_ptr.hbm [resolvable:$true] %s30_s20 }
   0x3   :  { %s32_s22 = sshll.u32 %s529_s21, 4  ;;  %s17_s25 = sshll.u32 %s585_s0, 4  ;;  %s33_s22 = int_to_ptr.vmem [resolvable:$true] %s32_s22  ;;  %s18_s25 = int_to_ptr.hbm [resolvable:$true] %s17_s25 }
   0x4   :  { %s530_s26 = smov 64   ;;  %s531_s27 = smov 4  }
   0x5   :  { %38 = dma.hbm_to_vmem [thread:$0]  %s31_s20, 1024, %s33_s22, [#allocation7], %s530_s26, %s530_s26, %s531_s27  }
   0x6   :  { %s532_s28 = smov [#allocation3]   ;;  %s45_s7 = sshll.u32 %s588_s3, 4  ;;  %s46_s7 = int_to_ptr.hbm [resolvable:$true] %s45_s7 }
   0x7   :  { %s19_s29 = sshll.u32 %s532_s28, 4  ;;  %s533_s1 = smov [#allocation8]   ;;  %s20_s29 = int_to_ptr.vmem [resolvable:$true] %s19_s29 }
   0x8   :  { %25 = dma.hbm_to_vmem [thread:$0]  %s18_s25, 128, %s20_s29, [#allocation4], %s530_s26, %s530_s26, %s531_s27  }
   0x9   :  { %s47_s8 = sshll.u32 %s533_s1, 4  ;;  %s48_s8 = int_to_ptr.vmem [resolvable:$true] %s47_s8 }
   0xa   :  { %53 = dma.hbm_to_vmem [thread:$0]  %s46_s7, 1024, %s48_s8, [#allocation7], %s530_s26, %s530_s26, %s531_s27  }
   0xb   :  { %523 = dma.done.wait [#allocation4], 128  }
   0xc   :  { %524 = vsyncadd [#allocation4], 4294967168 }
   0xd   :  { %525 = dma.done.wait [#allocation7], 2048  }
   0xe   :  { %526 = vsyncadd [#allocation7], 4294965248  ;;  %v400_v0 = vld [vmem:[#allocation6 + $0x38] sm:$0xff]  ;;  %v399_v1 = vld [vmem:[#allocation6 + $0x30] sm:$0xff]  ;;  %s308_s13 = sshll.u32 %s590_s5, 4  ;;  %s535_s14 = smov 128   ;;  %s309_s13 = int_to_ptr.hbm [resolvable:$true] %s308_s13 }
   0xf   :  { %148 = vmatpush.bf16.msra.mxu0 %v400_v0  ;;  %v408_v2 = vld [vmem:[#allocation8 + $0x38] sm:$0xff]  ;;  %v407_v3 = vld [vmem:[#allocation8 + $0x30] sm:$0xff]  ;;  %v398_v4 = vld [vmem:[#allocation6 + $0x28] sm:$0xff]  ;;  %s536_s15 = smov 8  }
  0x10   :  { %248 = vmatpush.bf16.msra.mxu1 %v408_v2  ;;  %v406_v5 = vld [vmem:[#allocation8 + $0x28] sm:$0xff]  ;;  %v397_v6 = vld [vmem:[#allocation6 + $0x20] sm:$0xff]  ;;  %v396_v8 = vld [vmem:[#allocation6 + $0x18] sm:$0xff] }
  0x11   :  { %v405_v7 = vld [vmem:[#allocation8 + $0x20] sm:$0xff]  ;;  %v395_v9 = vld [vmem:[#allocation6 + $0x10] sm:$0xff]  ;;  %v394_v10 = vld [vmem:[#allocation6 + $0x8] sm:$0xff] }
  0x12   :  { %v393_v11 = vld [vmem:[#allocation6] sm:$0xff]  ;;  %v392_v12 = vld [vmem:[#allocation3] sm:$0xff]  ;;  %v403_v14 = vld [vmem:[#allocation8 + $0x10] sm:$0xff] }
  0x13   :  { %149 = vmatpush.bf16.msra.mxu0 %v399_v1  ;;  %v404_v13 = vld [vmem:[#allocation8 + $0x18] sm:$0xff]  ;;  %v402_v15 = vld [vmem:[#allocation8 + $0x8] sm:$0xff]  ;;  %v401_v16 = vld [vmem:[#allocation8] sm:$0xff] }
  0x14   :  { %249 = vmatpush.bf16.msra.mxu1 %v407_v3  ;;  %v417_v18 = vld [vmem:[%s587_s2] ss:$0 sm:$0xff]  ;;  %s534_s2 = smov [#allocation9]  }
  0x15   :  { %v418_v25 = vld [vmem:[%s589_s4] ss:$0 sm:$0xff]  ;;  %s306_s4 = sshll.u32 %s534_s2, 4  ;;  %s307_s4 = int_to_ptr.vmem [resolvable:$true] %s306_s4 }
  0x17   :  { %150 = vmatpush.bf16.msra.mxu0 %v398_v4 }
  0x18   :  { %250 = vmatpush.bf16.msra.mxu1 %v406_v5 }
  0x1b   :  { %151 = vmatpush.bf16.msra.mxu0 %v397_v6 }
  0x1c   :  { %251 = vmatpush.bf16.msra.mxu1 %v405_v7 }
  0x1f   :  { %152 = vmatpush.bf16.msra.mxu0 %v396_v8 }
  0x20   :  { %252 = vmatpush.bf16.msra.mxu1 %v404_v13 }
  0x23   :  { %153 = vmatpush.bf16.msra.mxu0 %v395_v9 }
  0x24   :  { %253 = vmatpush.bf16.msra.mxu1 %v403_v14 }
  0x27   :  { %154 = vmatpush.bf16.msra.mxu0 %v394_v10 }
  0x28   :  { %254 = vmatpush.bf16.msra.mxu1 %v402_v15 }
  0x2b   :  { %155 = vmatpush.bf16.msra.mxu0 %v393_v11 }
  0x2c   :  { %255 = vmatpush.bf16.msra.mxu1 %v401_v16 }
  0x2e   :  { %156 = vmatmul.bf16.vlgmr.msra.gmra.mxu0 %v392_v12 }
  0xab   :  { %v157_v17 = vpop.f32.mrf.mxu0 }
  0xac   :  { %v175_v19 = vadd.f32 %v417_v18, %v157_v17 }
  0xae   :  { %v177_v22 = vmax.f32 %v175_v19, 0.0 }
  0xb3   :  { %v159_v20 = vpop.f32.mrf.mxu0 }
  0xb4   :  { %v176_v21 = vadd.f32 %v417_v18, %v159_v20 }
  0xb6   :  { %v178_v23 = vmax.f32 %v176_v21, 0.0 }
  0xb8   :  { %v179_v24 = vpack.c.bf16 %v178_v23, %v177_v22 }
  0xba   :  { %256 = vmatmul.bf16.vlgmr.msra.gmra.mxu1 %v179_v24 }
 0x137   :  { %v257_v26 = vpop.f32.mrf.mxu1 }
 0x138   :  { %v258_v27 = vadd.f32 %v418_v25, %v257_v26 }
 0x13a   :  { %v390_v28 = vmul.f32 -1.442695, %v258_v27 }
 0x13c   :  { %419 = vpow2.f32 %v390_v28 }
 0x13f   :  { %v259_v29 = vpop.f32.mrf.mxu1 }
 0x140   :  { %v260_v30 = vadd.f32 %v418_v25, %v259_v29 }
 0x142   :  { %v420_v31 = vpop.eup %419  ;;  %v391_v32 = vmul.f32 -1.442695, %v260_v30 }
 0x143   :  { %v268_v33 = vadd.f32 1.0, %v420_v31 }
 0x144   :  { %421 = vpow2.f32 %v391_v32 }
 0x145   :  { %423 = vrcp.f32 %v268_v33  ;;  %v281_v39 = vand.u32 2147483648, %v268_v33  ;;  %v279_v41 = vand.u32 2147483647, %v268_v33  ;;  %vm275_vm1 = vweird.f32 %v268_v33 }
 0x147   :  { %v282_v44 = vor.u32 1.1754944e-38, %v281_v39  ;;  %vm280_vm3 = vcmp.eq.f32.partialorder %v279_v41, 8.507059e+37 }
 0x14a   :  { %v422_v34 = vpop.eup %421 }
 0x14b   :  { %v424_v35 = vpop.eup %423  ;;  %v269_v36 = vadd.f32 1.0, %v422_v34 }
 0x14c   :  { %v271_v37 = vmul.f32 %v424_v35, %v268_v33  ;;  %vm276_vm0 = vweird.f32 %v424_v35 }
 0x14d   :  { %425 = vrcp.f32 %v269_v36  ;;  %vm277_vm2 = vmor %vm275_vm1, %vm276_vm0  ;;  %v296_v49 = vand.u32 2147483648, %v269_v36  ;;  %v294_v51 = vand.u32 2147483647, %v269_v36  ;;  %vm290_vm5 = vweird.f32 %v269_v36 }
 0x14e   :  { %v272_v38 = vsub.f32 1.0, %v271_v37 }
 0x14f   :  { %v297_v53 = vor.u32 1.1754944e-38, %v296_v49  ;;  %vm295_vm7 = vcmp.eq.f32.partialorder %v294_v51, 8.507059e+37 }
 0x150   :  { %v273_v40 = vmul.f32 %v424_v35, %v272_v38 }
 0x152   :  { %v274_v42 = vadd.f32 %v424_v35, %v273_v40 }
 0x153   :  { %v426_v43 = vpop.eup %425 }
 0x154   :  { %v286_v45 = vmul.f32 %v426_v43, %v269_v36  ;;  %v278_v46 = vsel %vm277_vm2, %v424_v35, %v274_v42  ;;  %vm291_vm4 = vweird.f32 %v426_v43 }
 0x155   :  { %v283_v47 = vsel %vm280_vm3, %v282_v44, %v278_v46  ;;  %vm292_vm6 = vmor %vm290_vm5, %vm291_vm4 }
 0x156   :  { %v287_v48 = vsub.f32 1.0, %v286_v45  ;;  %300 = vst [vmem:[#allocation9] sm:$0xff] %v283_v47 }
 0x158   :  { %v288_v50 = vmul.f32 %v426_v43, %v287_v48 }
 0x15a   :  { %v289_v52 = vadd.f32 %v426_v43, %v288_v50 }
 0x15c   :  { %v293_v54 = vsel %vm292_vm6, %v426_v43, %v289_v52 }
 0x15d   :  { %v298_v55 = vsel %vm295_vm7, %v297_v53, %v293_v54 }
 0x15e   :  { %301 = vst [vmem:[#allocation9 + $0x8] sm:$0xff] %v298_v55 }
 0x15f   :  { %314 = dma.vmem_to_hbm [thread:$0]  %s307_s4, 256, %s309_s13, [#allocation5], %s535_s14, %s535_s14, %s536_s15  }
 0x160   :  { %527 = dma.done.wait [#allocation5], 256  }
 0x161   :  { %528 = vsyncadd [#allocation5], 4294967040 }
 0x162   :  { %319 = vsyncpa [#allocation4], 1 }
 0x163   :  { %320 = vsyncpa [#allocation7], 1 }
 0x164   :  { %321 = vsyncpa [#allocation5], 1 }

</bundles_post_ra>
